<compile_context>
chip_gen: v7x
topology: tpu7x:2x2x1
jax: 0.10.0
libtpu: 0.0.40
codegen_flags: <defaults>
</compile_context>

<pallas_src>
import functools

import numpy as np
import jax
import jax.numpy as jnp
from jax import lax
from jax.experimental import pallas as pl
from jax.experimental.pallas import tpu as pltpu


# ----------------------------------------------------------------------------
# Pallas kernels
# ----------------------------------------------------------------------------
def _xa_aup_kernel(wstk_ref, wafe_ref, xa_ref, xss_ref, oa_ref, oup_ref, *, n_up):
    """xa path + composed-AUP matmul with a single stacked-weight MXU dot.

    y   = [W1b o AUP ; W1a] @ xa                      (one dot, K = C)
    oup = y[:n_up]                                    (pixel-shuffled later -> xs path)
    oa  = LeakyReLU_0.1( y[n_up:] + (W1b o AFE) @ s2d(xs) ) + xa
    """
    xa_b = xa_ref[0]                                            # (C, tl)
    y = jnp.dot(wstk_ref[...], xa_b, preferred_element_type=jnp.float32)
    oup_ref[0] = y[:n_up, :].astype(oup_ref.dtype)
    ya = y[n_up:, :] + jnp.dot(wafe_ref[...], xss_ref[0],
                               preferred_element_type=jnp.float32)
    ya = jnp.maximum(ya, 0.1 * ya)                              # LeakyReLU(0.1)
    oa_ref[0] = (ya + xa_b.astype(jnp.float32)).astype(oa_ref.dtype)


def _xs_fuse_kernel(w1a_ref, xs_ref, b_ref, o_ref):
    """xs path: out = LeakyReLU_0.1( W1a @ xs + bterm ) + xs."""
    xs_b = xs_ref[0]                                            # (C, tl)
    y = jnp.dot(w1a_ref[...], xs_b, preferred_element_type=jnp.float32)
    y = y + b_ref[0].astype(jnp.float32)
    y = jnp.maximum(y, 0.1 * y)
    o_ref[0] = (y + xs_b.astype(jnp.float32)).astype(o_ref.dtype)


def _hv_fuse_kernel(w3_ref, w2a_ref, mask_ref, xct_ref, xf_ref, o_ref,
                    slab_ref, *, S):
    """Fused 3x3 conv (weights pre-composed with W2b, kh/kw swapped so the
    .permute(0,1,3,2) is absorbed) + W2a @ xf + LeakyReLU(0.1) + xf residual.

    Everything is lane-dense (C, H*W).  The 9 taps are realised with
    pltpu.roll on the lane axis + precomputed zero-fill masks, staged into a
    (9C, H*W) VMEM slab, and contracted with one (C, 9C) @ (9C, H*W) MXU dot.
    """
    HW = S * S
    C = xf_ref.shape[1]
    xct = xct_ref[0].astype(jnp.float32)            # (C, HW), spatially transposed input
    for dh in (-1, 0, 1):
        for dw in (-1, 0, 1):
            k = (dh + 1) * 3 + (dw + 1)
            d = dh * S + dw
            if d == 0:
                t = xct
            else:
                t = pltpu.roll(xct, shift=(-d) % HW, axis=1) * mask_ref[k:k + 1, :]
            slab_ref[k * C:(k + 1) * C, :] = t
    xf = xf_ref[0].astype(jnp.float32)              # (C, HW)
    y = jnp.dot(w3_ref[...], slab_ref[...], preferred_element_type=jnp.float32)
    y = y + jnp.dot(w2a_ref[...], xf, preferred_element_type=jnp.float32)
    y = jnp.maximum(y, 0.1 * y)                     # LeakyReLU(0.1)
    o_ref[0] = (y + xf).astype(o_ref.dtype)


# ----------------------------------------------------------------------------
# pallas_call wrappers
# ----------------------------------------------------------------------------
def _pick_tl(L, max_tl=8192):
    # Lane tile: full L when it fits (block dim == array dim), else a 128-multiple.
    return L if L <= max_tl else max_tl


def xa_aup_call(w_stack, w_afe_eff, xa_f, xs_s2d):
    B, C, La = xa_f.shape
    Cs = xs_s2d.shape[1]
    CK = w_stack.shape[0]
    n_up = CK - C
    tl = _pick_tl(La)
    grid = (B, pl.cdiv(La, tl))
    return pl.pallas_call(
        functools.partial(_xa_aup_kernel, n_up=n_up),
        out_shape=(jax.ShapeDtypeStruct((B, C, La), xa_f.dtype),
                   jax.ShapeDtypeStruct((B, n_up, La), xa_f.dtype)),
        grid=grid,
        in_specs=[
            pl.BlockSpec((CK, C), lambda b, l: (0, 0)),
            pl.BlockSpec((C, Cs), lambda b, l: (0, 0)),
            pl.BlockSpec((1, C, tl), lambda b, l: (b, 0, l)),
            pl.BlockSpec((1, Cs, tl), lambda b, l: (b, 0, l)),
        ],
        out_specs=[pl.BlockSpec((1, C, tl), lambda b, l: (b, 0, l)),
                   pl.BlockSpec((1, n_up, tl), lambda b, l: (b, 0, l))],
        compiler_params=pltpu.CompilerParams(
            dimension_semantics=("parallel", "parallel")),
    )(w_stack, w_afe_eff, xa_f, xs_s2d)


def xs_fuse_call(w1a, xs_f, bterm):
    B, C, Ls = xs_f.shape
    tl = _pick_tl(Ls)
    grid = (B, pl.cdiv(Ls, tl))
    return pl.pallas_call(
        _xs_fuse_kernel,
        out_shape=jax.ShapeDtypeStruct((B, C, Ls), xs_f.dtype),
        grid=grid,
        in_specs=[
            pl.BlockSpec((C, C), lambda b, l: (0, 0)),
            pl.BlockSpec((1, C, tl), lambda b, l: (b, 0, l)),
            pl.BlockSpec((1, C, tl), lambda b, l: (b, 0, l)),
        ],
        out_specs=pl.BlockSpec((1, C, tl), lambda b, l: (b, 0, l)),
        compiler_params=pltpu.CompilerParams(
            dimension_semantics=("parallel", "parallel")),
    )(w1a, xs_f, bterm)


def hv_fuse_call(w3_mat, w2a, masks, xct_flat, xf_flat, S):
    """xct_flat: spatially-transposed conv input (lane-dense); xf_flat: residual."""
    B, C, HW = xf_flat.shape
    K9 = w3_mat.shape[1]
    # TODO(synk): for production C/H/W add an output-channel-group (or row-halo)
    # grid axis + explicit vmem_limit_bytes so whole-image blocks fit v7x VMEM.
    return pl.pallas_call(
        functools.partial(_hv_fuse_kernel, S=S),
        out_shape=jax.ShapeDtypeStruct((B, C, HW), xf_flat.dtype),
        grid=(B,),
        in_specs=[
            pl.BlockSpec((C, K9), lambda b: (0, 0)),
            pl.BlockSpec((C, C), lambda b: (0, 0)),
            pl.BlockSpec((9, HW), lambda b: (0, 0)),
            pl.BlockSpec((1, C, HW), lambda b: (b, 0, 0)),
            pl.BlockSpec((1, C, HW), lambda b: (b, 0, 0)),
        ],
        out_specs=pl.BlockSpec((1, C, HW), lambda b: (b, 0, 0)),
        scratch_shapes=[pltpu.VMEM((K9, HW), jnp.float32)],
        compiler_params=pltpu.CompilerParams(dimension_semantics=("parallel",)),
    )(w3_mat, w2a, masks, xct_flat, xf_flat)


def _shift_masks(S):
    """(9, S*S) zero-fill masks for the 9 rolled taps, tap-major (dh, dw) order."""
    r = np.arange(S * S) // S
    c = np.arange(S * S) % S
    rows = []
    for dh in (-1, 0, 1):
        for dw in (-1, 0, 1):
            ok = (r + dh >= 0) & (r + dh < S) & (c + dw >= 0) & (c + dw < S)
            rows.append(ok.astype(np.float32))
    return jnp.asarray(np.stack(rows, axis=0))


# ----------------------------------------------------------------------------
# Weight preparation (hoisted out of the hot path) and the forward pass
# ----------------------------------------------------------------------------
def prepare_params(params, ang_res):
    """Precompute composed / reshaped weights once, outside the step."""
    a = ang_res
    C = params["conv1"].shape[0]
    w1 = params["conv1"][:, :, 0, 0]                      # (C, 2C)
    w1a, w1b = w1[:, :C], w1[:, C:]
    w2 = params["conv2"][:, :, 0, 0]
    w2a, w2b = w2[:, :C], w2[:, C:]
    # AFE (kxk, stride k) composed with conv1's second half; columns ordered
    # (p, q, ci) to match the space-to-depth view of xs.
    w_afe = jnp.transpose(params["afe"], (0, 2, 3, 1)).reshape(C, a * a * C)
    w_afe_eff = w1b @ w_afe                               # (C, a*a*C)
    # AUP (1x1 -> a*a*C) composed with conv1's second half; rows ordered
    # o*a*a + p*a + q to match PixelShuffle.
    w_aup = params["aup"][:, :, 0, 0].reshape(C, a, a, C)
    w_aup_eff = jnp.einsum("oc,cpqi->opqi", w1b, w_aup).reshape(C * a * a, C)
    # Stacked weight for the xa kernel: one MXU push produces both the AUP term
    # (rows [:a*a*C], 8-aligned) and the W1a term (rows [a*a*C:]).
    w_stack = jnp.concatenate([w_aup_eff, w1a], axis=0)   # (a*a*C + C, C)
    # conv_h / conv_v composed with conv2's second half, kh/kw swapped (the
    # .permute(0,1,3,2) fold), tap-major (kh, kw, ci) flatten for the in-kernel
    # (C, 9C) @ (9C, H*W) contraction.
    w_h_eff = jnp.einsum("oc,cikl->oikl", w2b, params["conv_h"])
    w_v_eff = jnp.einsum("oc,cikl->oikl", w2b, params["conv_v"])
    w_h_mat = jnp.transpose(w_h_eff, (0, 3, 2, 1)).reshape(C, 9 * C)
    w_v_mat = jnp.transpose(w_v_eff, (0, 3, 2, 1)).reshape(C, 9 * C)
    return dict(w1a=w1a, w2a=w2a, w_afe_eff=w_afe_eff, w_stack=w_stack,
                w_h_mat=w_h_mat, w_v_mat=w_v_mat)


def a_s_hv_fuse_forward(prep, xa, xs, x_h, x_v, *, ang_res):
    a = ang_res
    B, C, Ha, Wa = xa.shape
    _, _, Hs, Ws = xs.shape
    assert Hs == Ha * a and Ws == Wa * a
    _, _, Hh, Wh = x_h.shape
    assert Hh == Wh and x_h.shape == x_v.shape   # required by .permute(0,1,3,2)
    La, Ls = Ha * Wa, Hs * Ws
    S, HW = Hh, Hh * Wh

    xa_f = xa.reshape(B, C, La)                  # free: NCHW is row-major
    xs_f = xs.reshape(B, C, Ls)

    # Space-to-depth view of xs for the strided AFE conv (feature order p,q,ci).
    # TODO(synk): fold this rearrangement into the xa kernel (strided reads or a
    # (p,q) grid phase axis) to drop one HBM round trip of xs.
    xs_s2d = (xs.reshape(B, C, Ha, a, Wa, a)
                .transpose(0, 3, 5, 1, 2, 4)
                .reshape(B, a * a * C, La))

    # xa path (fused AFE + conv1 + LeakyReLU + residual) and the composed-AUP
    # matmul, in a single pallas_call (xa is read from HBM only once).
    xa_out_f, upc = xa_aup_call(prep["w_stack"], prep["w_afe_eff"], xa_f, xs_s2d)
    xa_out = xa_out_f.reshape(B, C, Ha, Wa)

    # PixelShuffle of the (already W1b-composed) AUP term.
    # TODO(synk): consume `upc` directly in the xs kernel (lane-strided stores /
    # phase-aware index_map) to remove this HBM round trip.
    bterm = (upc.reshape(B, C, a, a, Ha, Wa)
                .transpose(0, 1, 4, 2, 5, 3)
                .reshape(B, C, Ls))

    xs_out = xs_fuse_call(prep["w1a"], xs_f, bterm).reshape(B, C, Hs, Ws)

    # xh / xv paths: the conv input is spatially transposed once here and the
    # 3x3 weights carry the matching kh/kw swap, so conv(x).permute(0,1,3,2)
    # lands directly in the lane-dense output layout inside the kernel.
    # TODO(synk): move this transpose in-kernel (XLU pass) to avoid the extra
    # HBM pass over x_h / x_v.
    xh_flat = x_h.reshape(B, C, HW)
    xv_flat = x_v.reshape(B, C, HW)
    xvt_flat = jnp.transpose(x_v, (0, 1, 3, 2)).reshape(B, C, HW)
    xht_flat = jnp.transpose(x_h, (0, 1, 3, 2)).reshape(B, C, HW)
    masks = _shift_masks(S)

    xh_out = hv_fuse_call(prep["w_h_mat"], prep["w2a"], masks, xvt_flat, xh_flat, S)
    xv_out = hv_fuse_call(prep["w_v_mat"], prep["w2a"], masks, xht_flat, xv_flat, S)
    return (xa_out, xs_out,
            xh_out.reshape(B, C, S, S), xv_out.reshape(B, C, S, S))


# ----------------------------------------------------------------------------
# Pure-JAX reference (independent, via lax.conv) for a correctness check
# ----------------------------------------------------------------------------
def _ref_forward(params, xa, xs, x_h, x_v, *, ang_res):
    a = ang_res
    dn = ("NCHW", "OIHW", "NCHW")
    conv = lambda x, w, s, pad: lax.conv_general_dilated(
        x, w, window_strides=(s, s), padding=pad, dimension_numbers=dn)
    lrelu = lambda x: jnp.where(x > 0, x, 0.1 * x)

    afe = conv(xs, params["afe"], a, "VALID")
    aup_c = conv(xa, params["aup"], 1, "VALID")
    B, K, Ha, Wa = aup_c.shape
    C = K // (a * a)
    aup = (
        aup_c.reshape(B, C, a, a, Ha, Wa)
        .transpose(0, 1, 4, 2, 5, 3)
        .reshape(B, C, Ha * a, Wa * a)
    )
    xa_o = lrelu(conv(jnp.concatenate([xa, afe], 1), params["conv1"], 1, "VALID")) + xa
    xs_o = lrelu(conv(jnp.concatenate([xs, aup], 1), params["conv1"], 1, "VALID")) + xs
    map_xh = conv(x_v, params["conv_h"], 1, [(1, 1), (1, 1)]).transpose(0, 1, 3, 2)
    map_xv = conv(x_h, params["conv_v"], 1, [(1, 1), (1, 1)]).transpose(0, 1, 3, 2)
    xh_o = lrelu(conv(jnp.concatenate([x_h, map_xh], 1), params["conv2"], 1, "VALID")) + x_h
    xv_o = lrelu(conv(jnp.concatenate([x_v, map_xv], 1), params["conv2"], 1, "VALID")) + x_v
    return xa_o, xs_o, xh_o, xv_o


# ----------------------------------------------------------------------------
if __name__ == "__main__":
    B, C, ANG = 2, 4, 2
    Ha = Wa = 8
    Hs = Ws = Ha * ANG            # 16
    S = 16                        # x_h / x_v spatial (square, as the permute requires)

    key = jax.random.PRNGKey(0)
    k = jax.random.split(key, 10)
    params = {
        "afe": 0.1 * jax.random.normal(k[0], (C, C, ANG, ANG), jnp.float32),
        "aup": 0.1 * jax.random.normal(k[1], (ANG * ANG * C, C, 1, 1), jnp.float32),
        "conv_h": 0.1 * jax.random.normal(k[2], (C, C, 3, 3), jnp.float32),
        "conv_v": 0.1 * jax.random.normal(k[3], (C, C, 3, 3), jnp.float32),
        "conv1": 0.1 * jax.random.normal(k[4], (C, 2 * C, 1, 1), jnp.float32),
        "conv2": 0.1 * jax.random.normal(k[5], (C, 2 * C, 1, 1), jnp.float32),
    }
    xa = jax.random.normal(k[6], (B, C, Ha, Wa), jnp.float32)
    xs = jax.random.normal(k[7], (B, C, Hs, Ws), jnp.float32)
    x_h = jax.random.normal(k[8], (B, C, S, S), jnp.float32)
    x_v = jax.random.normal(k[9], (B, C, S, S), jnp.float32)

    prep = prepare_params(params, ANG)            # hoisted out of the hot path
    fwd = jax.jit(functools.partial(a_s_hv_fuse_forward, ang_res=ANG))
    outs = jax.block_until_ready(fwd(prep, xa, xs, x_h, x_v))

    refs = _ref_forward(params, xa, xs, x_h, x_v, ang_res=ANG)
    for o, r in zip(outs, refs):
        assert o.shape == r.shape and o.dtype == r.dtype
        err = float(jnp.max(jnp.abs(o - r)))
        assert err < 2e-3, f"mismatch vs reference: {err}"

    print("KERNEL_OK")
</pallas_src>

<mosaic_0001>
module attributes {stable_mosaic.version = 11 : i64} {
  func.func @_xa_aup_kernel(%arg0: i32, %arg1: i32, %arg2: memref<20x4xf32, #tpu.memory_space<vmem>>, %arg3: memref<4x16xf32, #tpu.memory_space<vmem>>, %arg4: memref<1x4x64xf32, #tpu.memory_space<vmem>>, %arg5: memref<1x16x64xf32, #tpu.memory_space<vmem>>, %arg6: memref<1x4x64xf32, #tpu.memory_space<vmem>>, %arg7: memref<1x16x64xf32, #tpu.memory_space<vmem>>) attributes {dimension_semantics = [#tpu.dimension_semantics<parallel>, #tpu.dimension_semantics<parallel>], iteration_bounds = array<i64: 2, 1>, scalar_prefetch = 0 : i64, scratch_operands = 0 : i64, tpu.core_type = #tpu.core_type<tc>, window_params = [{pipeline_mode = #tpu.pipeline_mode<synchronous>, transform_indices = @transform_0, window_bounds = array<i64: 20, 4>}, {pipeline_mode = #tpu.pipeline_mode<synchronous>, transform_indices = @transform_1, window_bounds = array<i64: 4, 16>}, {transform_indices = @transform_2, window_bounds = array<i64: 1, 4, 64>}, {transform_indices = @transform_3, window_bounds = array<i64: 1, 16, 64>}, {transform_indices = @transform_4, window_bounds = array<i64: 1, 4, 64>}, {transform_indices = @transform_5, window_bounds = array<i64: 1, 16, 64>}]} {
    %c0 = arith.constant 0 : index
    %c0_0 = arith.constant 0 : index
    %c0_1 = arith.constant 0 : index
    %0 = vector.load %arg4[%c0, %c0_0, %c0_1] : memref<1x4x64xf32, #tpu.memory_space<vmem>>, vector<1x4x64xf32>
    %1 = vector.shape_cast %0 : vector<1x4x64xf32> to vector<4x64xf32>
    %c0_2 = arith.constant 0 : index
    %c0_3 = arith.constant 0 : index
    %2 = vector.load %arg2[%c0_2, %c0_3] : memref<20x4xf32, #tpu.memory_space<vmem>>, vector<20x4xf32>
    %cst = arith.constant dense<0.000000e+00> : vector<20x64xf32>
    %3 = tpu.matmul %2, %1, %cst {dimension_numbers = #tpu.dot_dimension_numbers<[1], [0], [0], [1], [0, 0, 1, 1], [], []>} : vector<20x4xf32>, vector<4x64xf32>, vector<20x64xf32> -> vector<20x64xf32>
    %4 = vector.extract_strided_slice %3 {offsets = [0, 0], sizes = [16, 64], strides = [1, 1]} : vector<20x64xf32> to vector<16x64xf32>
    %c0_4 = arith.constant 0 : index
    %c0_5 = arith.constant 0 : index
    %c0_6 = arith.constant 0 : index
    %5 = vector.load %arg7[%c0_4, %c0_5, %c0_6] : memref<1x16x64xf32, #tpu.memory_space<vmem>>, vector<1x16x64xf32>
    %6 = vector.shape_cast %5 : vector<1x16x64xf32> to vector<16x64xf32>
    %7 = vector.shape_cast %4 : vector<16x64xf32> to vector<1x16x64xf32>
    tpu.vector_store %arg7[%c0_4, %c0_5, %c0_6], %7 {strides = array<i32>} : memref<1x16x64xf32, #tpu.memory_space<vmem>>, vector<1x16x64xf32>,
    %8 = vector.extract_strided_slice %3 {offsets = [16, 0], sizes = [4, 64], strides = [1, 1]} : vector<20x64xf32> to vector<4x64xf32>
    %c0_7 = arith.constant 0 : index
    %c0_8 = arith.constant 0 : index
    %9 = vector.load %arg3[%c0_7, %c0_8] : memref<4x16xf32, #tpu.memory_space<vmem>>, vector<4x16xf32>
    %c0_9 = arith.constant 0 : index
    %c0_10 = arith.constant 0 : index
    %c0_11 = arith.constant 0 : index
    %10 = vector.load %arg5[%c0_9, %c0_10, %c0_11] : memref<1x16x64xf32, #tpu.memory_space<vmem>>, vector<1x16x64xf32>
    %11 = vector.shape_cast %10 : vector<1x16x64xf32> to vector<16x64xf32>
    %cst_12 = arith.constant dense<0.000000e+00> : vector<4x64xf32>
    %12 = tpu.matmul %9, %11, %cst_12 {dimension_numbers = #tpu.dot_dimension_numbers<[1], [0], [0], [1], [0, 0, 1, 1], [], []>} : vector<4x16xf32>, vector<16x64xf32>, vector<4x64xf32> -> vector<4x64xf32>
    %13 = arith.addf %8, %12 : vector<4x64xf32>
    %cst_13 = arith.constant 1.000000e-01 : f32
    %14 = vector.broadcast %cst_13 : f32 to vector<4x64xf32>
    %15 = arith.mulf %14, %13 : vector<4x64xf32>
    %16 = arith.maximumf %13, %15 : vector<4x64xf32>
    %17 = arith.addf %16, %1 : vector<4x64xf32>
    %c0_14 = arith.constant 0 : index
    %c0_15 = arith.constant 0 : index
    %c0_16 = arith.constant 0 : index
    %18 = vector.load %arg6[%c0_14, %c0_15, %c0_16] : memref<1x4x64xf32, #tpu.memory_space<vmem>>, vector<1x4x64xf32>
    %19 = vector.shape_cast %18 : vector<1x4x64xf32> to vector<4x64xf32>
    %20 = vector.shape_cast %17 : vector<4x64xf32> to vector<1x4x64xf32>
    tpu.vector_store %arg6[%c0_14, %c0_15, %c0_16], %20 {strides = array<i32>} : memref<1x4x64xf32, #tpu.memory_space<vmem>>, vector<1x4x64xf32>,
    return
  }
  func.func @transform_0(%arg0: i32, %arg1: i32) -> (i32, i32) {
    %c0_i32 = arith.constant 0 : i32
    %c0_i32_0 = arith.constant 0 : i32
    %c0_i32_1 = arith.constant 0 : i32
    return %c0_i32, %c0_i32_0 : i32, i32
  }
  func.func @transform_1(%arg0: i32, %arg1: i32) -> (i32, i32) {
    %c0_i32 = arith.constant 0 : i32
    %c0_i32_0 = arith.constant 0 : i32
    %c0_i32_1 = arith.constant 0 : i32
    return %c0_i32, %c0_i32_0 : i32, i32
  }
  func.func @transform_2(%arg0: i32, %arg1: i32) -> (i32, i32, i32) {
    %c0_i32 = arith.constant 0 : i32
    %c0_i32_0 = arith.constant 0 : i32
    return %arg0, %c0_i32, %arg1 : i32, i32, i32
  }
  func.func @transform_3(%arg0: i32, %arg1: i32) -> (i32, i32, i32) {
    %c0_i32 = arith.constant 0 : i32
    %c0_i32_0 = arith.constant 0 : i32
    return %arg0, %c0_i32, %arg1 : i32, i32, i32
  }
  func.func @transform_4(%arg0: i32, %arg1: i32) -> (i32, i32, i32) {
    %c0_i32 = arith.constant 0 : i32
    %c0_i32_0 = arith.constant 0 : i32
    return %arg0, %c0_i32, %arg1 : i32, i32, i32
  }
  func.func @transform_5(%arg0: i32, %arg1: i32) -> (i32, i32, i32) {
    %c0_i32 = arith.constant 0 : i32
    %c0_i32_0 = arith.constant 0 : i32
    return %arg0, %c0_i32, %arg1 : i32, i32, i32
  }
}

module attributes {stable_mosaic.version = 11 : i64} {
  func.func @_xs_fuse_kernel(%arg0: i32, %arg1: i32, %arg2: memref<4x4xf32, #tpu.memory_space<vmem>>, %arg3: memref<1x4x256xf32, #tpu.memory_space<vmem>>, %arg4: memref<1x4x256xf32, #tpu.memory_space<vmem>>, %arg5: memref<1x4x256xf32, #tpu.memory_space<vmem>>) attributes {dimension_semantics = [#tpu.dimension_semantics<parallel>, #tpu.dimension_semantics<parallel>], iteration_bounds = array<i64: 2, 1>, scalar_prefetch = 0 : i64, scratch_operands = 0 : i64, tpu.core_type = #tpu.core_type<tc>, window_params = [{pipeline_mode = #tpu.pipeline_mode<synchronous>, transform_indices = @transform_0, window_bounds = array<i64: 4, 4>}, {transform_indices = @transform_1, window_bounds = array<i64: 1, 4, 256>}, {transform_indices = @transform_2, window_bounds = array<i64: 1, 4, 256>}, {transform_indices = @transform_3, window_bounds = array<i64: 1, 4, 256>}]} {
    %c0 = arith.constant 0 : index
    %c0_0 = arith.constant 0 : index
    %c0_1 = arith.constant 0 : index
    %0 = vector.load %arg3[%c0, %c0_0, %c0_1] : memref<1x4x256xf32, #tpu.memory_space<vmem>>, vector<1x4x256xf32>
    %1 = vector.shape_cast %0 : vector<1x4x256xf32> to vector<4x256xf32>
    %c0_2 = arith.constant 0 : index
    %c0_3 = arith.constant 0 : index
    %2 = vector.load %arg2[%c0_2, %c0_3] : memref<4x4xf32, #tpu.memory_space<vmem>>, vector<4x4xf32>
    %cst = arith.constant dense<0.000000e+00> : vector<4x256xf32>
    %3 = tpu.matmul %2, %1, %cst {dimension_numbers = #tpu.dot_dimension_numbers<[1], [0], [0], [1], [0, 0, 1, 1], [], []>} : vector<4x4xf32>, vector<4x256xf32>, vector<4x256xf32> -> vector<4x256xf32>
    %c0_4 = arith.constant 0 : index
    %c0_5 = arith.constant 0 : index
    %c0_6 = arith.constant 0 : index
    %4 = vector.load %arg4[%c0_4, %c0_5, %c0_6] : memref<1x4x256xf32, #tpu.memory_space<vmem>>, vector<1x4x256xf32>
    %5 = vector.shape_cast %4 : vector<1x4x256xf32> to vector<4x256xf32>
    %6 = arith.addf %3, %5 : vector<4x256xf32>
    %cst_7 = arith.constant 1.000000e-01 : f32
    %7 = vector.broadcast %cst_7 : f32 to vector<4x256xf32>
    %8 = arith.mulf %7, %6 : vector<4x256xf32>
    %9 = arith.maximumf %6, %8 : vector<4x256xf32>
    %10 = arith.addf %9, %1 : vector<4x256xf32>
    %c0_8 = arith.constant 0 : index
    %c0_9 = arith.constant 0 : index
    %c0_10 = arith.constant 0 : index
    %11 = vector.load %arg5[%c0_8, %c0_9, %c0_10] : memref<1x4x256xf32, #tpu.memory_space<vmem>>, vector<1x4x256xf32>
    %12 = vector.shape_cast %11 : vector<1x4x256xf32> to vector<4x256xf32>
    %13 = vector.shape_cast %10 : vector<4x256xf32> to vector<1x4x256xf32>
    tpu.vector_store %arg5[%c0_8, %c0_9, %c0_10], %13 {strides = array<i32>} : memref<1x4x256xf32, #tpu.memory_space<vmem>>, vector<1x4x256xf32>,
    return
  }
  func.func @transform_0(%arg0: i32, %arg1: i32) -> (i32, i32) {
    %c0_i32 = arith.constant 0 : i32
    %c0_i32_0 = arith.constant 0 : i32
    %c0_i32_1 = arith.constant 0 : i32
    return %c0_i32, %c0_i32_0 : i32, i32
  }
  func.func @transform_1(%arg0: i32, %arg1: i32) -> (i32, i32, i32) {
    %c0_i32 = arith.constant 0 : i32
    %c0_i32_0 = arith.constant 0 : i32
    return %arg0, %c0_i32, %arg1 : i32, i32, i32
  }
  func.func @transform_2(%arg0: i32, %arg1: i32) -> (i32, i32, i32) {
    %c0_i32 = arith.constant 0 : i32
    %c0_i32_0 = arith.constant 0 : i32
    return %arg0, %c0_i32, %arg1 : i32, i32, i32
  }
  func.func @transform_3(%arg0: i32, %arg1: i32) -> (i32, i32, i32) {
    %c0_i32 = arith.constant 0 : i32
    %c0_i32_0 = arith.constant 0 : i32
    return %arg0, %c0_i32, %arg1 : i32, i32, i32
  }
}

module attributes {stable_mosaic.version = 11 : i64} {
  func.func @_hv_fuse_kernel(%arg0: i32, %arg1: memref<4x36xf32, #tpu.memory_space<vmem>>, %arg2: memref<4x4xf32, #tpu.memory_space<vmem>>, %arg3: memref<9x256xf32, #tpu.memory_space<vmem>>, %arg4: memref<1x4x256xf32, #tpu.memory_space<vmem>>, %arg5: memref<1x4x256xf32, #tpu.memory_space<vmem>>, %arg6: memref<1x4x256xf32, #tpu.memory_space<vmem>>, %arg7: memref<36x256xf32, #tpu.memory_space<vmem>>) attributes {dimension_semantics = [#tpu.dimension_semantics<parallel>], iteration_bounds = array<i64: 2>, scalar_prefetch = 0 : i64, scratch_operands = 1 : i64, tpu.core_type = #tpu.core_type<tc>, window_params = [{pipeline_mode = #tpu.pipeline_mode<synchronous>, transform_indices = @transform_0, window_bounds = array<i64: 4, 36>}, {pipeline_mode = #tpu.pipeline_mode<synchronous>, transform_indices = @transform_1, window_bounds = array<i64: 4, 4>}, {pipeline_mode = #tpu.pipeline_mode<synchronous>, transform_indices = @transform_2, window_bounds = array<i64: 9, 256>}, {transform_indices = @transform_3, window_bounds = array<i64: 1, 4, 256>}, {transform_indices = @transform_4, window_bounds = array<i64: 1, 4, 256>}, {transform_indices = @transform_5, window_bounds = array<i64: 1, 4, 256>}]} {
    %c0 = arith.constant 0 : index
    %c0_0 = arith.constant 0 : index
    %c0_1 = arith.constant 0 : index
    %0 = vector.load %arg4[%c0, %c0_0, %c0_1] : memref<1x4x256xf32, #tpu.memory_space<vmem>>, vector<1x4x256xf32>
    %1 = vector.shape_cast %0 : vector<1x4x256xf32> to vector<4x256xf32>
    %c17_i32 = arith.constant 17 : i32
    %2 = tpu.dynamic_rotate %1 by %c17_i32 dim 1 : vector<4x256xf32>, i32 -> vector<4x256xf32>
    %c0_2 = arith.constant 0 : index
    %c0_3 = arith.constant 0 : index
    %3 = vector.load %arg3[%c0_2, %c0_3] : memref<9x256xf32, #tpu.memory_space<vmem>>, vector<1x256xf32>
    %4 = vector.broadcast %3 : vector<1x256xf32> to vector<4x256xf32>
    %5 = arith.mulf %2, %4 : vector<4x256xf32>
    %c0_4 = arith.constant 0 : index
    %c0_5 = arith.constant 0 : index
    %6 = vector.load %arg7[%c0_4, %c0_5] : memref<36x256xf32, #tpu.memory_space<vmem>>, vector<4x256xf32>
    tpu.vector_store %arg7[%c0_4, %c0_5], %5 {strides = array<i32>} : memref<36x256xf32, #tpu.memory_space<vmem>>, vector<4x256xf32>,
    %c16_i32 = arith.constant 16 : i32
    %7 = tpu.dynamic_rotate %1 by %c16_i32 dim 1 : vector<4x256xf32>, i32 -> vector<4x256xf32>
    %c1 = arith.constant 1 : index
    %c0_6 = arith.constant 0 : index
    %8 = vector.load %arg3[%c1, %c0_6] : memref<9x256xf32, #tpu.memory_space<vmem>>, vector<1x256xf32>
    %9 = vector.broadcast %8 : vector<1x256xf32> to vector<4x256xf32>
    %10 = arith.mulf %7, %9 : vector<4x256xf32>
    %c4 = arith.constant 4 : index
    %c0_7 = arith.constant 0 : index
    %11 = vector.load %arg7[%c4, %c0_7] : memref<36x256xf32, #tpu.memory_space<vmem>>, vector<4x256xf32>
    tpu.vector_store %arg7[%c4, %c0_7], %10 {strides = array<i32>} : memref<36x256xf32, #tpu.memory_space<vmem>>, vector<4x256xf32>,
    %c15_i32 = arith.constant 15 : i32
    %12 = tpu.dynamic_rotate %1 by %c15_i32 dim 1 : vector<4x256xf32>, i32 -> vector<4x256xf32>
    %c2 = arith.constant 2 : index
    %c0_8 = arith.constant 0 : index
    %13 = vector.load %arg3[%c2, %c0_8] : memref<9x256xf32, #tpu.memory_space<vmem>>, vector<1x256xf32>
    %14 = vector.broadcast %13 : vector<1x256xf32> to vector<4x256xf32>
    %15 = arith.mulf %12, %14 : vector<4x256xf32>
    %c8 = arith.constant 8 : index
    %c0_9 = arith.constant 0 : index
    %16 = vector.load %arg7[%c8, %c0_9] : memref<36x256xf32, #tpu.memory_space<vmem>>, vector<4x256xf32>
    tpu.vector_store %arg7[%c8, %c0_9], %15 {strides = array<i32>} : memref<36x256xf32, #tpu.memory_space<vmem>>, vector<4x256xf32>,
    %c1_i32 = arith.constant 1 : i32
    %17 = tpu.dynamic_rotate %1 by %c1_i32 dim 1 : vector<4x256xf32>, i32 -> vector<4x256xf32>
    %c3 = arith.constant 3 : index
    %c0_10 = arith.constant 0 : index
    %18 = vector.load %arg3[%c3, %c0_10] : memref<9x256xf32, #tpu.memory_space<vmem>>, vector<1x256xf32>
    %19 = vector.broadcast %18 : vector<1x256xf32> to vector<4x256xf32>
    %20 = arith.mulf %17, %19 : vector<4x256xf32>
    %c12 = arith.constant 12 : index
    %c0_11 = arith.constant 0 : index
    %21 = vector.load %arg7[%c12, %c0_11] : memref<36x256xf32, #tpu.memory_space<vmem>>, vector<4x256xf32>
    tpu.vector_store %arg7[%c12, %c0_11], %20 {strides = array<i32>} : memref<36x256xf32, #tpu.memory_space<vmem>>, vector<4x256xf32>,
    %c16 = arith.constant 16 : index
    %c0_12 = arith.constant 0 : index
    %22 = vector.load %arg7[%c16, %c0_12] : memref<36x256xf32, #tpu.memory_space<vmem>>, vector<4x256xf32>
    tpu.vector_store %arg7[%c16, %c0_12], %1 {strides = array<i32>} : memref<36x256xf32, #tpu.memory_space<vmem>>, vector<4x256xf32>,
    %c255_i32 = arith.constant 255 : i32
    %23 = tpu.dynamic_rotate %1 by %c255_i32 dim 1 : vector<4x256xf32>, i32 -> vector<4x256xf32>
    %c5 = arith.constant 5 : index
    %c0_13 = arith.constant 0 : index
    %24 = vector.load %arg3[%c5, %c0_13] : memref<9x256xf32, #tpu.memory_space<vmem>>, vector<1x256xf32>
    %25 = vector.broadcast %24 : vector<1x256xf32> to vector<4x256xf32>
    %26 = arith.mulf %23, %25 : vector<4x256xf32>
    %c20 = arith.constant 20 : index
    %c0_14 = arith.constant 0 : index
    %27 = vector.load %arg7[%c20, %c0_14] : memref<36x256xf32, #tpu.memory_space<vmem>>, vector<4x256xf32>
    tpu.vector_store %arg7[%c20, %c0_14], %26 {strides = array<i32>} : memref<36x256xf32, #tpu.memory_space<vmem>>, vector<4x256xf32>,
    %c241_i32 = arith.constant 241 : i32
    %28 = tpu.dynamic_rotate %1 by %c241_i32 dim 1 : vector<4x256xf32>, i32 -> vector<4x256xf32>
    %c6 = arith.constant 6 : index
    %c0_15 = arith.constant 0 : index
    %29 = vector.load %arg3[%c6, %c0_15] : memref<9x256xf32, #tpu.memory_space<vmem>>, vector<1x256xf32>
    %30 = vector.broadcast %29 : vector<1x256xf32> to vector<4x256xf32>
    %31 = arith.mulf %28, %30 : vector<4x256xf32>
    %c24 = arith.constant 24 : index
    %c0_16 = arith.constant 0 : index
    %32 = vector.load %arg7[%c24, %c0_16] : memref<36x256xf32, #tpu.memory_space<vmem>>, vector<4x256xf32>
    tpu.vector_store %arg7[%c24, %c0_16], %31 {strides = array<i32>} : memref<36x256xf32, #tpu.memory_space<vmem>>, vector<4x256xf32>,
    %c240_i32 = arith.constant 240 : i32
    %33 = tpu.dynamic_rotate %1 by %c240_i32 dim 1 : vector<4x256xf32>, i32 -> vector<4x256xf32>
    %c7 = arith.constant 7 : index
    %c0_17 = arith.constant 0 : index
    %34 = vector.load %arg3[%c7, %c0_17] : memref<9x256xf32, #tpu.memory_space<vmem>>, vector<1x256xf32>
    %35 = vector.broadcast %34 : vector<1x256xf32> to vector<4x256xf32>
    %36 = arith.mulf %33, %35 : vector<4x256xf32>
    %c28 = arith.constant 28 : index
    %c0_18 = arith.constant 0 : index
    %37 = vector.load %arg7[%c28, %c0_18] : memref<36x256xf32, #tpu.memory_space<vmem>>, vector<4x256xf32>
    tpu.vector_store %arg7[%c28, %c0_18], %36 {strides = array<i32>} : memref<36x256xf32, #tpu.memory_space<vmem>>, vector<4x256xf32>,
    %c239_i32 = arith.constant 239 : i32
    %38 = tpu.dynamic_rotate %1 by %c239_i32 dim 1 : vector<4x256xf32>, i32 -> vector<4x256xf32>
    %c8_19 = arith.constant 8 : index
    %c0_20 = arith.constant 0 : index
    %39 = vector.load %arg3[%c8_19, %c0_20] : memref<9x256xf32, #tpu.memory_space<vmem>>, vector<1x256xf32>
    %40 = vector.broadcast %39 : vector<1x256xf32> to vector<4x256xf32>
    %41 = arith.mulf %38, %40 : vector<4x256xf32>
    %c32 = arith.constant 32 : index
    %c0_21 = arith.constant 0 : index
    %42 = vector.load %arg7[%c32, %c0_21] : memref<36x256xf32, #tpu.memory_space<vmem>>, vector<4x256xf32>
    tpu.vector_store %arg7[%c32, %c0_21], %41 {strides = array<i32>} : memref<36x256xf32, #tpu.memory_space<vmem>>, vector<4x256xf32>,
    %c0_22 = arith.constant 0 : index
    %c0_23 = arith.constant 0 : index
    %c0_24 = arith.constant 0 : index
    %43 = vector.load %arg5[%c0_22, %c0_23, %c0_24] : memref<1x4x256xf32, #tpu.memory_space<vmem>>, vector<1x4x256xf32>
    %44 = vector.shape_cast %43 : vector<1x4x256xf32> to vector<4x256xf32>
    %c0_25 = arith.constant 0 : index
    %c0_26 = arith.constant 0 : index
    %45 = vector.load %arg1[%c0_25, %c0_26] : memref<4x36xf32, #tpu.memory_space<vmem>>, vector<4x36xf32>
    %c0_27 = arith.constant 0 : index
    %c0_28 = arith.constant 0 : index
    %46 = vector.load %arg7[%c0_27, %c0_28] : memref<36x256xf32, #tpu.memory_space<vmem>>, vector<36x256xf32>
    %cst = arith.constant dense<0.000000e+00> : vector<4x256xf32>
    %47 = tpu.matmul %45, %46, %cst {dimension_numbers = #tpu.dot_dimension_numbers<[1], [0], [0], [1], [0, 0, 1, 1], [], []>} : vector<4x36xf32>, vector<36x256xf32>, vector<4x256xf32> -> vector<4x256xf32>
    %c0_29 = arith.constant 0 : index
    %c0_30 = arith.constant 0 : index
    %48 = vector.load %arg2[%c0_29, %c0_30] : memref<4x4xf32, #tpu.memory_space<vmem>>, vector<4x4xf32>
    %cst_31 = arith.constant dense<0.000000e+00> : vector<4x256xf32>
    %49 = tpu.matmul %48, %44, %cst_31 {dimension_numbers = #tpu.dot_dimension_numbers<[1], [0], [0], [1], [0, 0, 1, 1], [], []>} : vector<4x4xf32>, vector<4x256xf32>, vector<4x256xf32> -> vector<4x256xf32>
    %50 = arith.addf %47, %49 : vector<4x256xf32>
    %cst_32 = arith.constant 1.000000e-01 : f32
    %51 = vector.broadcast %cst_32 : f32 to vector<4x256xf32>
    %52 = arith.mulf %51, %50 : vector<4x256xf32>
    %53 = arith.maximumf %50, %52 : vector<4x256xf32>
    %54 = arith.addf %53, %44 : vector<4x256xf32>
    %c0_33 = arith.constant 0 : index
    %c0_34 = arith.constant 0 : index
    %c0_35 = arith.constant 0 : index
    %55 = vector.load %arg6[%c0_33, %c0_34, %c0_35] : memref<1x4x256xf32, #tpu.memory_space<vmem>>, vector<1x4x256xf32>
    %56 = vector.shape_cast %55 : vector<1x4x256xf32> to vector<4x256xf32>
    %57 = vector.shape_cast %54 : vector<4x256xf32> to vector<1x4x256xf32>
    tpu.vector_store %arg6[%c0_33, %c0_34, %c0_35], %57 {strides = array<i32>} : memref<1x4x256xf32, #tpu.memory_space<vmem>>, vector<1x4x256xf32>,
    return
  }
  func.func @transform_0(%arg0: i32) -> (i32, i32) {
    %c0_i32 = arith.constant 0 : i32
    %c0_i32_0 = arith.constant 0 : i32
    %c0_i32_1 = arith.constant 0 : i32
    return %c0_i32, %c0_i32_0 : i32, i32
  }
  func.func @transform_1(%arg0: i32) -> (i32, i32) {
    %c0_i32 = arith.constant 0 : i32
    %c0_i32_0 = arith.constant 0 : i32
    %c0_i32_1 = arith.constant 0 : i32
    return %c0_i32, %c0_i32_0 : i32, i32
  }
  func.func @transform_2(%arg0: i32) -> (i32, i32) {
    %c0_i32 = arith.constant 0 : i32
    %c0_i32_0 = arith.constant 0 : i32
    %c0_i32_1 = arith.constant 0 : i32
    return %c0_i32, %c0_i32_0 : i32, i32
  }
  func.func @transform_3(%arg0: i32) -> (i32, i32, i32) {
    %c0_i32 = arith.constant 0 : i32
    %c0_i32_0 = arith.constant 0 : i32
    %c0_i32_1 = arith.constant 0 : i32
    return %arg0, %c0_i32, %c0_i32_0 : i32, i32, i32
  }
  func.func @transform_4(%arg0: i32) -> (i32, i32, i32) {
    %c0_i32 = arith.constant 0 : i32
    %c0_i32_0 = arith.constant 0 : i32
    %c0_i32_1 = arith.constant 0 : i32
    return %arg0, %c0_i32, %c0_i32_0 : i32, i32, i32
  }
  func.func @transform_5(%arg0: i32) -> (i32, i32, i32) {
    %c0_i32 = arith.constant 0 : i32
    %c0_i32_0 = arith.constant 0 : i32
    %c0_i32_1 = arith.constant 0 : i32
    return %arg0, %c0_i32, %c0_i32_0 : i32, i32, i32
  }
}

</mosaic_0001>

<bundles_post_ra>
// kernel: a_s_hv_fuse_forward.4
= control target key start
LH: loop header
LB: loop body
LE: loop exit
PB: predicated region body
PF: predicated region fallthrough
CT: control target
= control target key end

     0   :  { %s761_s18 = smov 0   ;;  %s763_s19 = smov 0   ;;  %s827_s0 = inlined_call_operand.vmem [shape: f32[20,4], index: 0, kind: input, shape index: {}]   ;;  %s828_s1 = inlined_call_operand.vmem [shape: f32[4,16], index: 1, kind: input, shape index: {}]   ;;  %s829_s2 = inlined_call_operand.vmem [shape: f32[2,4,64], index: 2, kind: input, shape index: {}]   ;;  %s830_s3 = inlined_call_operand.vmem [shape: f32[2,16,64], index: 3, kind: input, shape index: {}]   ;;  %s831_s4 = inlined_call_operand.vmem [shape: f32[2,4,64], index: 4, kind: output, shape index: {0}]   ;;  %s832_s5 = inlined_call_operand.vmem [shape: f32[2,16,64], index: 5, kind: output, shape index: {1}]  }
   0x1   :  { %s765_s20 = smov 0  }
   0x2 LB: > { %s28_s21 = sadd.s32 1, %s722_s19  ;;  %p630_p0 = scmp.ge.s32.totalorder %s726_s20, 1  ;;  %s726_s20 = sphi %s765_s20, %s16_s20   ;;  %s722_s19 = sphi %s763_s19, %s834_s19   ;;  %s718_s18 = sphi %s761_s18, %s833_s18  }
   0x3   : > { %p30_p1 = scmp.ge.s32.totalorder %s28_s21, 2  ;;  %p225_p2 = scmp.lt.s32.totalorder %s726_s20, 3 }
   0x5   : > { %s836_s21 = smov (%p30_p1, %s28_s21), 0  ;;  %p226_p3 = pnand %p630_p0, %p225_p2 }
   0x6   : > { %p273_p4 = scmp.lt.s32.totalorder (!%p226_p3), %s718_s18, 1  ;;  %v728_v0 = vmov (!%p226_p3), 0.0   ;;  %vm729_vm0 = vmmov (!%p226_p3), 0   ;;  %vm317_vm1 = vcmask (!%p226_p3), 1043456   ;;  %v304_v1 = vld [vmem:[%s827_s0] sm:$0xff] (!%p226_p3)  ;;  %vm307_vm2 = vcmask (!%p226_p3), 31744  }
   0x7   : > { %229 = sbr.rel (%p226_p3) target bundleno = 245 (0xf5), region = 36  ;;  %653 = vmatprep.subr.mxu0 (!%p226_p3), %v728_v0  ;;  %674 = vmatprep.subr.mxu1 (!%p226_p3), %v728_v0  ;;  %v305_v2 = vld [vmem:[%s827_s0 + $0x8] sm:$0xff] (!%p226_p3)  ;;  %v730_v7 = vmov (!%p226_p3), 0.0|0.0   ;;  %v306_v8 = vld [vmem:[%s827_s0 + $0x10] sm:$0xf] (!%p226_p3)  ;;  %vm407_vm3 = vcmask (!%p226_p3), 130048  }
   0x8   : > { %655 = vmatprep.mubr.msk.f32.mxu0 (!%p226_p3), %vm729_vm0, %v728_v0  ;;  %658 = vmatprep.mubr.msk.f32.mxu1 (!%p226_p3), %vm729_vm0, %v728_v0  ;;  %v404_v9 = vld [vmem:[%s828_s1] sm:$0xf] (!%p226_p3)  ;;  %vm401_vm4 = vcmask (!%p226_p3), 523264   ;;  %vm485_vm5 = vcmask (!%p226_p3), 519168  }
   0xe   : > { %s838_s18 = smov (!%p273_p4, %s718_s18), 1 }
   0xf   : > { %s631_s22 = sshll.u32 %s838_s18, 2  ;;  %s644_s23 = sshll.u32 %s838_s18, 4 }
  0x10   : > { %s279_s26 = scalar_lea.vmem %s829_s2, %s631_s22  ;;  %s287_s29 = scalar_lea.vmem %s830_s3, %s644_s23 }
  0x11   : > { %v303_v3 = vld [vmem:[%s279_s26] sm:$0xf]  ;;  %v406_v5 = vld [vmem:[%s287_s29 + $0x8] sm:$0xff]  ;;  %s302_s15 = scalar_lea.vmem %s832_s5, %s644_s23  ;;  %s294_s24 = scalar_lea.vmem %s831_s4, %s631_s22 }
  0x12   : > { %v405_v4 = vld [vmem:[%s287_s29] sm:$0xff]  ;;  %654 = vmatpush3.msk.msra.mxu0 %vm317_vm1, %v303_v3  ;;  %675 = vmatpush3.msk.msra.mxu1 %vm317_vm1, %v303_v3 }
  0x13   : > { %v672_v6 = vpack.c.bf16 %v406_v5, %v405_v4  ;;  %656 = vmatmul.mubr.msk.f32.vlgmr.msra.gmra.mrb[0].mxu0 %vm307_vm2, %v304_v1  ;;  %659 = vmatmul.mubr.msk.f32.vlgmr.msra.gmra.mrb[0].mxu1 %vm307_vm2, %v305_v2 }
  0x14   : > { %671 = vmatprep.subr.bf16.mxu0 %v730_v7  ;;  %661 = vmatprep.mubr.msk.f32.mxu1 %vm729_vm0, %v728_v0 }
  0x15   : > { %673 = vmatpush3.bf16.msra.mxu0 %v672_v6  ;;  %668 = vmatprep.mubr.msk.f32.mxu0 %vm729_vm0, %v728_v0 }
  0x17   : > { %662 = vmatmul.mubr.msk.f32.gmra.mrb[2].mxu1 %vm307_vm2, %v306_v8 }
  0x18   : > { %669 = vmatmul.mubr.msk.f32.vlgmr.msra.gmra.mrb[2].mxu0 %vm407_vm3, %v404_v9 }
  0xe6   : > { %v387_v10 = vpop.f32.mrb[0].mxu0  ;;  %v392_v11 = vpop.f32.mrb[0].mxu1 }
  0xe7   : > { %402 = vst.msk [vmem:[%s302_s15] sm:$0xff] %vm401_vm4, %v387_v10  ;;  %403 = vst.msk [vmem:[%s302_s15 + $0x8] sm:$0xff] %vm401_vm4, %v392_v11  ;;  %v657_v12 = vpop.f32.mrb[1].mxu0  ;;  %v660_v13 = vpop.f32.mrb[1].mxu1 }
  0xea   : > { %v397_v14 = vpop.f32.mrb[2].mxu1 }
  0xeb   : > { %v477_v15 = vpop.f32.mrb[2].mxu0  ;;  %v663_v16 = vpop.f32.mrb[3].mxu1 }
  0xec   : > { %v481_v17 = vadd.f32 %v477_v15, %v397_v14  ;;  %v670_v18 = vpop.f32.mrb[3].mxu0 }
  0xee   : > { %v482_v19 = vmul.f32 0.1, %v481_v17 }
  0xf0   : > { %v483_v20 = vmax.f32 %v481_v17, %v482_v19 }
  0xf2   : > { %v484_v21 = vadd.f32 %v483_v20, %v303_v3 }
  0xf4   : > { %486 = vst.msk [vmem:[%s294_s24] sm:$0xf] %vm485_vm5, %v484_v21 }
  0xf5 PF: > { %s16_s20 = sadd.s32 1, %s726_s20   ;;  %s833_s18 = smov %s722_s19 }
  0xf6   : > { %p13_p5 = scmp.ge.s32.totalorder %s16_s20, 4   ;;  %s834_s19 = smov %s836_s21 }
  0xf8   :  { %15 = sbr.rel (!%p13_p5) target bundleno = 2 (0x2), region = 81 }

// kernel: a_s_hv_fuse_forward.5
= control target key start
LH: loop header
LB: loop body
LE: loop exit
PB: predicated region body
PF: predicated region fallthrough
CT: control target
= control target key end

     0   :  { %s542_s12 = smov 0   ;;  %s544_s13 = smov 0   ;;  %s581_s0 = inlined_call_operand.vmem [shape: f32[4,4], index: 0, kind: input, shape index: {}]   ;;  %s582_s1 = inlined_call_operand.vmem [shape: f32[2,4,256], index: 1, kind: input, shape index: {}]   ;;  %s583_s2 = inlined_call_operand.vmem [shape: f32[2,4,256], index: 2, kind: input, shape index: {}]   ;;  %s584_s3 = inlined_call_operand.vmem [shape: f32[2,4,256], index: 3, kind: output, shape index: {}]  }
   0x1   :  { %s546_s14 = smov 0  }
   0x2 LB: > { %s25_s15 = sadd.s32 1, %s515_s13  ;;  %p455_p0 = scmp.ge.s32.totalorder %s519_s14, 1  ;;  %s519_s14 = sphi %s546_s14, %s13_s14   ;;  %s515_s13 = sphi %s544_s13, %s586_s13   ;;  %s511_s12 = sphi %s542_s12, %s585_s12  }
   0x3   : > { %p27_p1 = scmp.ge.s32.totalorder %s25_s15, 2  ;;  %p175_p2 = scmp.lt.s32.totalorder %s519_s14, 3 }
   0x5   : > { %s588_s15 = smov (%p27_p1, %s25_s15), 0  ;;  %p176_p3 = pnand %p455_p0, %p175_p2 }
   0x6   : > { %p217_p4 = scmp.lt.s32.totalorder (!%p176_p3), %s511_s12, 1  ;;  %v521_v0 = vmov (!%p176_p3), 0.0   ;;  %vm258_vm0 = vcmask (!%p176_p3), 1043456   ;;  %v247_v3 = vld [vmem:[%s581_s0] sm:$0xf] (!%p176_p3)  ;;  %vm254_vm1 = vcmask (!%p176_p3), 31744  }
   0x7   : > { %179 = sbr.rel (%p176_p3) target bundleno = 246 (0xf6), region = 32  ;;  %327 = vmatprep.mubr.f32.mxu0 (!%p176_p3), %v521_v0 }
   0xe   : > { %s590_s12 = smov (!%p217_p4, %s511_s12), 1 }
   0xf   : > { %s467_s16 = sshll.u32 %s590_s12, 3 }
  0x10   : > { %s224_s19 = scalar_lea.vmem %s582_s1, %s467_s16  ;;  %s234_s24 = scalar_lea.vmem %s583_s2, %s467_s16 }
  0x11   : > { %v246_v1 = vld [vmem:[%s224_s19] sm:$0xff]  ;;  %s244_s27 = scalar_lea.vmem %s584_s3, %s467_s16 }
  0x12   : > { %v250_v2 = vcombine.high %v246_v1, %v246_v1  ;;  %v248_v4 = vld [vmem:[%s234_s24] sm:$0xff] }
  0x13   : > { %v252_v5 = vcombine.high %v248_v4, %v248_v4 }
  0x14   : > { %462 = vmatprep.subr.msk.mxu0 %vm258_vm0, %v250_v2 }
  0x15   : > { %463 = vmatpush1.msk.msra.mxu0 %vm258_vm0, %v246_v1 }
  0x16   : > { %464 = vmatmul.mubr.msk.f32.vlgmr.msra.gmra.mrb[0].mxu0 %vm254_vm1, %v247_v3 }
  0xe9   : > { %v329_v6 = vpop.f32.mrb[0].mxu0 }
  0xea   : > { %v330_v7 = vadd.f32 %v329_v6, %v248_v4  ;;  %v331_v8 = vpop.f32.mrb[1].mxu0 }
  0xeb   : > { %v332_v9 = vadd.f32 %v331_v8, %v252_v5 }
  0xec   : > { %v334_v10 = vmul.f32 0.1, %v330_v7 }
  0xed   : > { %v335_v11 = vmul.f32 0.1, %v332_v9 }
  0xee   : > { %v336_v12 = vmax.f32 %v330_v7, %v334_v10 }
  0xef   : > { %v337_v13 = vmax.f32 %v332_v9, %v335_v11 }
  0xf0   : > { %v339_v14 = vadd.f32 %v336_v12, %v246_v1 }
  0xf1   : > { %v340_v15 = vadd.f32 %v337_v13, %v250_v2 }
  0xf3   : > { %v343_v16 = vcombine.low %v339_v14, %v340_v15 }
  0xf5   : > { %345 = vst [vmem:[%s244_s27] sm:$0xff] %v343_v16 }
  0xf6 PF: > { %s13_s14 = sadd.s32 1, %s519_s14   ;;  %s585_s12 = smov %s515_s13 }
  0xf7   : > { %p10_p5 = scmp.ge.s32.totalorder %s13_s14, 4   ;;  %s586_s13 = smov %s588_s15 }
  0xf9   :  { %12 = sbr.rel (!%p10_p5) target bundleno = 2 (0x2), region = 65 }

// kernel: a_s_hv_fuse_forward.6
= control target key start
LH: loop header
LB: loop body
LE: loop exit
PB: predicated region body
PF: predicated region fallthrough
CT: control target
= control target key end

     0   :  { %s828_s18 = smov 0   ;;  %s943_s0 = inlined_call_operand.vmem [shape: f32[4,36], index: 0, kind: input, shape index: {}]   ;;  %s944_s1 = inlined_call_operand.vmem [shape: f32[4,4], index: 1, kind: input, shape index: {}]   ;;  %s945_s2 = inlined_call_operand.vmem [shape: f32[9,256], index: 2, kind: input, shape index: {}]   ;;  %s946_s3 = inlined_call_operand.vmem [shape: f32[2,4,256], index: 3, kind: input, shape index: {}]   ;;  %s947_s4 = inlined_call_operand.vmem [shape: f32[2,4,256], index: 4, kind: input, shape index: {}]   ;;  %s948_s5 = inlined_call_operand.vmem [shape: f32[2,4,256], index: 5, kind: output, shape index: {}]  }
   0x1 LB: > { %s723_s19 = sadd.s32 4294967295, %s787_s18   ;;  %p727_p0 = scmp.ge.s32.totalorder %s787_s18, 1  ;;  %s787_s18 = sphi %s828_s18, %s15_s18  }
   0x2   : > { %p197_p1 = scmp.lt.s32.totalorder %s787_s18, 3 }
   0x4   : > { %p198_p2 = pnand %p727_p0, %p197_p1 }
   0x5   : > { %p230_p3 = scmp.lt.s32.totalorder (!%p198_p2), %s723_s19, 1  ;;  %s789_s24 = smov (!%p198_p2), 1   ;;  %vm487_vm0 = vcmask (!%p198_p2), 1043456   ;;  %v796_v4 = vmov (!%p198_p2), 0.0   ;;  %v480_v5 = vld [vmem:[%s944_s1] sm:$0xf] (!%p198_p2)  ;;  %v253_v6 = vlaneseq (!%p198_p2) }
   0x6   : > { %201 = sbr.rel (%p198_p2) target bundleno = 399 (0x18f), region = 40  ;;  %s790_s25 = smov (!%p198_p2), 16   ;;  %556 = vmatprep.mubr.f32.mxu1 (!%p198_p2), %v796_v4  ;;  %637 = vmatprep.mubr.f32.mxu0 (!%p198_p2), %v796_v4  ;;  %vm483_vm1 = vcmask (!%p198_p2), 31744   ;;  %v736_v11 = vld [vmem:[%s945_s2 + $0x3] ss:$8 sm:$0x3] (!%p198_p2) }
   0x7   : > { %s791_s26 = smov (!%p198_p2), 17   ;;  %s792_s27 = smov (!%p198_p2), 15   ;;  %v261_v7 = vshrl.u32 (!%p198_p2), %v253_v6, 7  ;;  %v859_v8 = vand.u32 (!%p198_p2), 127, %v253_v6  ;;  %vm563_vm10 = vcmask (!%p198_p2), 293888  }
   0x8   : > { %s793_s28 = smov (!%p198_p2), 127   ;;  %s794_s29 = smov (!%p198_p2), 112   ;;  %v258_v16 = vld [vmem:[%s945_s2] ss:$8 sm:$0x3] (!%p198_p2) }
   0x9   : > { %s795_s8 = smov (!%p198_p2), 113   ;;  %s797_s11 = smov (!%p198_p2), 111   ;;  %v861_v9 = vsub.s32 (!%p198_p2), 0, %v261_v7  ;;  %v863_v10 = vsub.s32 (!%p198_p2), 1, %v261_v7  ;;  %vm332_vm2 = vcmp.lt.s32.totalorder (!%p198_p2), %v859_v8, 1  ;;  %vm255_vm3 = vcmp.lt.s32.totalorder (!%p198_p2), %v859_v8, 17 }
   0xa   : > { %v734_v17 = vld [vmem:[%s945_s2 + $0x1] ss:$8 sm:$0x3] (!%p198_p2)  ;;  %vm278_vm4 = vcmp.lt.s32.totalorder (!%p198_p2), %v859_v8, 16  ;;  %vm308_vm5 = vcmp.lt.s32.totalorder (!%p198_p2), %v859_v8, 15  ;;  %vm364_vm6 = vcmp.lt.s32.totalorder (!%p198_p2), %v859_v8, 127 }
   0xb   : > { %v341_v14 = vrot.slane (!%p198_p2), %v736_v11, %v861_v9  ;;  %v345_v15 = vrot.slane (!%p198_p2), %v736_v11, %v863_v10  ;;  %v263_v22 = vrot.slane (!%p198_p2), %v258_v16, %v861_v9  ;;  %v267_v23 = vrot.slane (!%p198_p2), %v258_v16, %v863_v10  ;;  %v735_v24 = vld [vmem:[%s945_s2 + $0x2] ss:$8 sm:$0x3] (!%p198_p2)  ;;  %v737_v43 = vld [vmem:[%s945_s2 + $0x5] ss:$8 sm:$0x3] (!%p198_p2) }
   0xc   : > { %v287_v27 = vrot.slane (!%p198_p2), %v734_v17, %v861_v9  ;;  %v291_v28 = vrot.slane (!%p198_p2), %v734_v17, %v863_v10  ;;  %v317_v33 = vrot.slane (!%p198_p2), %v735_v24, %v861_v9  ;;  %v321_v34 = vrot.slane (!%p198_p2), %v735_v24, %v863_v10  ;;  %v739_v54 = vld [vmem:[%s945_s2 + $0x7] ss:$8 sm:$0x3] (!%p198_p2)  ;;  %v738_v63 = vld [vmem:[%s945_s2 + $0x6] ss:$8 sm:$0x3] (!%p198_p2) }
   0xd   : > { %s950_s19 = smov (!%p230_p3, %s723_s19), 1  ;;  %v373_v52 = vrot.slane %v737_v43, %v861_v9  ;;  %v377_v53 = vrot.slane %v737_v43, %v863_v10  ;;  %vm418_vm7 = vcmp.lt.s32.totalorder %v859_v8, 112  ;;  %v427_v61 = vrot.slane %v739_v54, %v861_v9  ;;  %v740_v16 = vld [vmem:[%s945_s2 + $0x10] ss:$8 sm:$0x3] }
   0xe   : > { %s836_s20 = sshll.u32 %s950_s19, 3  ;;  %v431_v62 = vrot.slane %v739_v54, %v863_v10  ;;  %vm394_vm8 = vcmp.lt.s32.totalorder %v859_v8, 113  ;;  %vm448_vm9 = vcmp.lt.s32.totalorder %v859_v8, 111  ;;  %v469_v43 = vld [vmem:[%s943_s0] sm:$0xf] }
   0xf   : > { %s234_s23 = scalar_lea.vmem %s946_s3, %s836_s20  ;;  %s239_s7 = scalar_lea.vmem %s947_s4, %s836_s20 }
  0x10   : > { %v245_v0 = vld [vmem:[%s234_s23] sm:$0xff]  ;;  %s244_s9 = scalar_lea.vmem %s948_s5, %s836_s20 }
  0x11   : > { %328 = vrot.lane.b32.xlu1 %v245_v0, %s789_s24  ;;  %358 = vst [vmem:[#allocation2 + $0x20] sm:$0xf] %v245_v0  ;;  %274 = vrot.lane.b32.xlu0 %v245_v0, %s790_s25  ;;  %v247_v1 = vcombine.high %v245_v0, %v245_v0  ;;  %v846_v2 = vld [vmem:[%s239_s7] sm:$0xff] }
  0x12   : > { %v850_v3 = vcombine.high %v846_v2, %v846_v2 }
  0x13   : > { %359 = vst [vmem:[#allocation2 + $0x28] sm:$0xf] %v247_v1 }
  0x14   : > { %741 = vmatprep.subr.msk.mxu1 %vm487_vm0, %v850_v3 }
  0x15   : > { %249 = vrot.lane.b32.xlu0 %v245_v0, %s791_s26  ;;  %330 = vrot.lane.b32.xlu1 %v247_v1, %s789_s24 }
  0x16   : > { %742 = vmatpush1.msk.msra.mxu1 %vm487_vm0, %v846_v2 }
  0x17   : > { %743 = vmatmul.mubr.msk.f32.vlgmr.msra.gmra.mrb[0].mxu1 %vm483_vm1, %v480_v5 }
  0x19   : > { %251 = vrot.lane.b32.xlu1 %v247_v1, %s791_s26  ;;  %276 = vrot.lane.b32.xlu0 %v247_v1, %s790_s25 }
  0x1d   : > { %306 = vrot.lane.b32.xlu1 %v247_v1, %s792_s27  ;;  %304 = vrot.lane.b32.xlu0 %v245_v0, %s792_s27 }
  0x21   : > { %362 = vrot.lane.b32.xlu1 %v247_v1, %s793_s28  ;;  %360 = vrot.lane.b32.xlu0 %v245_v0, %s793_s28 }
  0x25   : > { %416 = vrot.lane.b32.xlu1 %v247_v1, %s794_s29  ;;  %414 = vrot.lane.b32.xlu0 %v245_v0, %s794_s29 }
  0x29   : > { %392 = vrot.lane.b32.xlu1 %v247_v1, %s795_s8  ;;  %390 = vrot.lane.b32.xlu0 %v245_v0, %s795_s8 }
  0x2d   : > { %446 = vrot.lane.b32.xlu1 %v247_v1, %s797_s11  ;;  %444 = vrot.lane.b32.xlu0 %v245_v0, %s797_s11 }
  0x83   : > { %v329_v12 = vpop.permute.xlu1 %328  ;;  %v275_v13 = vpop.permute.xlu0 %274 }
  0x87   : > { %v250_v18 = vpop.permute.xlu0 %249  ;;  %v331_v19 = vpop.permute.xlu1 %330 }
  0x88   : > { %v333_v20 = vsel %vm332_vm2, %v329_v12, %v331_v19  ;;  %v334_v21 = vsel %vm332_vm2, %v331_v19, %v329_v12 }
  0x89   : > { %v348_v25 = vmul.f32 %v341_v14, %v334_v21  ;;  %v349_v26 = vmul.f32 %v345_v15, %v333_v20  ;;  %v407_v14 = vrot.slane %v738_v63, %v863_v10 }
  0x8b   : > { %v352_v29 = vrot.slane %v348_v25, 4  ;;  %v353_v30 = vrot.slane %v349_v26, 4  ;;  %v252_v31 = vpop.permute.xlu1 %251  ;;  %v277_v32 = vpop.permute.xlu0 %276 }
  0x8c   : > { %v256_v35 = vsel %vm255_vm3, %v250_v18, %v252_v31  ;;  %v257_v36 = vsel %vm255_vm3, %v252_v31, %v250_v18  ;;  %v279_v37 = vsel %vm278_vm4, %v275_v13, %v277_v32  ;;  %v280_v38 = vsel %vm278_vm4, %v277_v32, %v275_v13 }
  0x8d   : > { %356 = vst [vmem:[#allocation2 + $0x10] sm:$0xf0] %v352_v29  ;;  %357 = vst [vmem:[#allocation2 + $0x18] sm:$0xf0] %v353_v30  ;;  %v270_v39 = vmul.f32 %v263_v22, %v257_v36  ;;  %v271_v40 = vmul.f32 %v267_v23, %v256_v35  ;;  %v294_v41 = vmul.f32 %v287_v27, %v280_v38 }
  0x8e   : > { %v295_v42 = vmul.f32 %v291_v28, %v279_v37  ;;  %v403_v13 = vrot.slane %v738_v63, %v861_v9  ;;  %v457_v30 = vrot.slane %v740_v16, %v861_v9  ;;  %v461_v31 = vrot.slane %v740_v16, %v863_v10 }
  0x8f   : > { %272 = vst [vmem:[#allocation2] sm:$0xf] %v270_v39  ;;  %273 = vst [vmem:[#allocation2 + $0x8] sm:$0xf] %v271_v40  ;;  %v298_v44 = vrot.slane %v294_v41, 4  ;;  %v307_v46 = vpop.permute.xlu1 %306  ;;  %v305_v47 = vpop.permute.xlu0 %304 }
  0x90   : > { %v299_v45 = vrot.slane %v295_v42, 4  ;;  %v309_v48 = vsel %vm308_vm5, %v305_v47, %v307_v46  ;;  %v310_v49 = vsel %vm308_vm5, %v307_v46, %v305_v47 }
  0x91   : > { %302 = vst [vmem:[#allocation2] sm:$0xf0] %v298_v44  ;;  %v324_v50 = vmul.f32 %v317_v33, %v310_v49  ;;  %v325_v51 = vmul.f32 %v321_v34, %v309_v48 }
  0x92   : > { %303 = vst [vmem:[#allocation2 + $0x8] sm:$0xf0] %v299_v45 }
  0x93   : > { %326 = vst [vmem:[#allocation2 + $0x10] sm:$0xf] %v324_v50  ;;  %327 = vst [vmem:[#allocation2 + $0x18] sm:$0xf] %v325_v51  ;;  %v363_v55 = vpop.permute.xlu1 %362  ;;  %v361_v56 = vpop.permute.xlu0 %360 }
  0x94   : > { %v365_v57 = vsel %vm364_vm6, %v361_v56, %v363_v55  ;;  %v366_v58 = vsel %vm364_vm6, %v363_v55, %v361_v56 }
  0x95   : > { %v380_v59 = vmul.f32 %v373_v52, %v365_v57  ;;  %v381_v60 = vmul.f32 %v377_v53, %v366_v58 }
  0x97   : > { %v384_v0 = vrot.slane %v380_v59, 4  ;;  %v385_v1 = vrot.slane %v381_v60, 4  ;;  %v417_v4 = vpop.permute.xlu1 %416  ;;  %v415_v5 = vpop.permute.xlu0 %414 }
  0x98   : > { %v419_v6 = vsel %vm418_vm7, %v415_v5, %v417_v4  ;;  %v420_v7 = vsel %vm418_vm7, %v417_v4, %v415_v5  ;;  %v470_v18 = vld [vmem:[#allocation2] sm:$0xff] }
  0x99   : > { %388 = vst [vmem:[#allocation2 + $0x20] sm:$0xf0] %v384_v0  ;;  %389 = vst [vmem:[#allocation2 + $0x28] sm:$0xf0] %v385_v1  ;;  %v434_v11 = vmul.f32 %v427_v61, %v419_v6  ;;  %v435_v12 = vmul.f32 %v431_v62, %v420_v7  ;;  %v471_v15 = vld [vmem:[#allocation2 + $0x8] sm:$0xff] }
  0x9a   : > { %v473_v17 = vld [vmem:[#allocation2 + $0x18] sm:$0xff]  ;;  %v472_v19 = vld [vmem:[#allocation2 + $0x10] sm:$0xff] }
  0x9b   : > { %v438_v20 = vrot.slane %v434_v11, 4  ;;  %v439_v21 = vrot.slane %v435_v12, 4  ;;  %v393_v22 = vpop.permute.xlu1 %392  ;;  %v391_v23 = vpop.permute.xlu0 %390  ;;  %v752_v24 = vpack.c.bf16 %v473_v17, %v471_v15  ;;  %v754_v25 = vpack.c.bf16 %v472_v19, %v470_v18 }
  0x9c   : > { %v395_v26 = vsel %vm394_vm8, %v391_v23, %v393_v22  ;;  %v396_v27 = vsel %vm394_vm8, %v393_v22, %v391_v23 }
  0x9d   : > { %442 = vst [vmem:[#allocation2 + $0x30] sm:$0xf0] %v438_v20  ;;  %443 = vst [vmem:[#allocation2 + $0x38] sm:$0xf0] %v439_v21  ;;  %v410_v28 = vmul.f32 %v403_v13, %v395_v26  ;;  %v411_v29 = vmul.f32 %v407_v14, %v396_v27  ;;  %753 = vmatprep.subr.bf16.mxu0 %v752_v24 }
  0x9e   : > { %755 = vmatpush1.bf16.msra.mxu0 %v754_v25 }
  0x9f   : > { %412 = vst [vmem:[#allocation2 + $0x30] sm:$0xf] %v410_v28  ;;  %413 = vst [vmem:[#allocation2 + $0x38] sm:$0xf] %v411_v29  ;;  %v447_v32 = vpop.permute.xlu1 %446  ;;  %v445_v33 = vpop.permute.xlu0 %444 }
  0xa0   : > { %v449_v34 = vsel %vm448_vm9, %v445_v33, %v447_v32  ;;  %v450_v35 = vsel %vm448_vm9, %v447_v32, %v445_v33  ;;  %v475_v8 = vld [vmem:[#allocation2 + $0x28] sm:$0xff]  ;;  %v474_v39 = vld [vmem:[#allocation2 + $0x20] sm:$0xff] }
  0xa1   : > { %v464_v36 = vmul.f32 %v457_v30, %v449_v34  ;;  %v465_v37 = vmul.f32 %v461_v31, %v450_v35 }
  0xa3   : > { %466 = vst [vmem:[#allocation2 + $0x40] sm:$0xf] %v464_v36  ;;  %467 = vst [vmem:[#allocation2 + $0x48] sm:$0xf] %v465_v37 }
  0xa6   : > { %v477_v38 = vld [vmem:[#allocation2 + $0x38] sm:$0xff]  ;;  %v476_v40 = vld [vmem:[#allocation2 + $0x30] sm:$0xff] }
  0xa7   : > { %v756_v41 = vpack.c.bf16 %v477_v38, %v475_v8  ;;  %v758_v42 = vpack.c.bf16 %v476_v40, %v474_v39 }
  0xa9   : > { %757 = vmatprep.subr.bf16.mxu0 %v756_v41 }
  0xaa   : > { %759 = vmatpush1.bf16.msra.mxu0 %v758_v42  ;;  %v479_v9 = vld [vmem:[#allocation2 + $0x48] sm:$0xf]  ;;  %v478_v10 = vld [vmem:[#allocation2 + $0x40] sm:$0xf] }
  0xab   : > { %744 = vmatprep.subr.msk.mxu0 %vm487_vm0, %v479_v9 }
  0xae   : > { %745 = vmatpush1.msk.msra.mxu0 %vm487_vm0, %v478_v10 }
  0xaf   : > { %746 = vmatmul.mubr.msk.f32.vlgmr.msra.gmra.mrb[0].mxu0 %vm563_vm10, %v469_v43 }
  0xea   : > { %v558_v44 = vpop.f32.mrb[0].mxu1 }
  0xeb   : > { %v560_v45 = vpop.f32.mrb[1].mxu1 }
 0x182   : > { %v639_v46 = vpop.f32.mrb[0].mxu0 }
 0x183   : > { %v640_v47 = vadd.f32 %v639_v46, %v558_v44  ;;  %v641_v48 = vpop.f32.mrb[1].mxu0 }
 0x184   : > { %v642_v49 = vadd.f32 %v641_v48, %v560_v45 }
 0x185   : > { %v644_v50 = vmul.f32 0.1, %v640_v47 }
 0x186   : > { %v645_v51 = vmul.f32 0.1, %v642_v49 }
 0x187   : > { %v646_v52 = vmax.f32 %v640_v47, %v644_v50 }
 0x188   : > { %v647_v53 = vmax.f32 %v642_v49, %v645_v51 }
 0x189   : > { %v649_v54 = vadd.f32 %v646_v52, %v846_v2 }
 0x18a   : > { %v650_v55 = vadd.f32 %v647_v53, %v850_v3 }
 0x18c   : > { %v653_v56 = vcombine.low %v649_v54, %v650_v55 }
 0x18e   : > { %655 = vst [vmem:[%s244_s9] sm:$0xff] %v653_v56 }
 0x18f PF: > { %s15_s18 = sadd.s32 1, %s787_s18  }
 0x190   : > { %p12_p4 = scmp.ge.s32.totalorder %s15_s18, 4  }
 0x192   :  { %14 = sbr.rel (!%p12_p4) target bundleno = 1 (0x1), region = 80 }

</bundles_post_ra>
